<compile_context>
chip_gen: v7x
topology: tpu7x:2x2x1
jax: 0.10.0
libtpu: 0.0.40
codegen_flags: <defaults>
</compile_context>

<pallas_src>
import functools

import jax
import jax.numpy as jnp
from jax.experimental import pallas as pl
from jax.experimental.pallas import tpu as pltpu

EMB_DIM = 64
HIDDEN = 256
LANE = 128


def _round_up(x, m):
    return ((x + m - 1) // m) * m


def _make_kernel(action_dim):
    value_col = action_dim        # critic value lane in fused layer-2 output
    logp_col = action_dim         # output-slab lane carrying log_prob
    val_col = action_dim + 1      # output-slab lane carrying state value
    ent_col = action_dim + 2      # output-slab lane carrying entropy

    def kernel(state_ref, action_ref, table_ref, w1_ref, b1_ref, w2_ref, b2_ref,
               out_ref):
        tile_b = state_ref.shape[0]
        state_pad = table_ref.shape[0]

        state_col = state_ref[...]      # (TILE_B, 1) int32
        action_col = action_ref[...]    # (TILE_B, 1) int32

        # ---- embedding lookup as one-hot @ table (MXU, exact: one-hot is 0/1) ----
        srange = jax.lax.broadcasted_iota(jnp.int32, (tile_b, state_pad), 1)
        onehot_s = jnp.where(srange == state_col, 1.0, 0.0).astype(jnp.float32)
        emb = jnp.dot(onehot_s, table_ref[...], preferred_element_type=jnp.float32)

        # ---- fused layer 1 (actor ++ critic), single MXU call ----
        h = jnp.dot(emb, w1_ref[...], preferred_element_type=jnp.float32) + b1_ref[...]
        h = jnp.maximum(h, 0.0)

        # ---- fused block-diagonal layer 2, single MXU call ----
        z_all = jnp.dot(h, w2_ref[...], preferred_element_type=jnp.float32) + b2_ref[...]

        col = jax.lax.broadcasted_iota(jnp.int32, z_all.shape, 1)

        # critic value (lane == value_col)
        value = jnp.sum(jnp.where(col == value_col, z_all, 0.0),
                        axis=-1, keepdims=True)

        # actor: mask padded + value lanes with a large finite negative before softmax
        neg_big = jnp.float32(-1e30)
        logits = jnp.where(col < action_dim, z_all, neg_big)
        m = jnp.max(logits, axis=-1, keepdims=True)
        zc = logits - m
        e = jnp.exp(zc)                                # padded lanes underflow to 0
        s = jnp.sum(e, axis=-1, keepdims=True)
        log_probs = zc - jnp.log(s)                    # padded lanes stay finite
        probs = e * pl.reciprocal(s, approx=False)     # softmax; padded lanes -> 0

        logp = jnp.sum(jnp.where(col == action_col, log_probs, 0.0),
                       axis=-1, keepdims=True)
        entropy = -jnp.sum(probs * log_probs, axis=-1, keepdims=True)

        # pack probs + (logp, value, entropy) into one lane-dense slab
        out = jnp.where(col == logp_col, logp, probs)
        out = jnp.where(col == val_col, value, out)
        out = jnp.where(col == ent_col, entropy, out)
        out_ref[...] = out

    return kernel


def _batch_tile(i):
    return (i, 0)


def _resident(i):
    return (0, 0)


def init_params(key, state_dim, action_dim, hidden=HIDDEN, emb_dim=EMB_DIM):
    """Deterministic synthetic parameters (shapes match the PyTorch module)."""
    ks = jax.random.split(key, 5)

    def lin(k, fan_in, fan_out):
        # PyTorch nn.Linear default init; weights stored as (in, out).
        bound = 1.0 / jnp.sqrt(fan_in)
        kw, kb = jax.random.split(k)
        w = jax.random.uniform(kw, (fan_in, fan_out), jnp.float32, -bound, bound)
        b = jax.random.uniform(kb, (1, fan_out), jnp.float32, -bound, bound)
        return w, b

    params = {}
    params["embedding"] = jax.random.normal(ks[0], (state_dim, emb_dim), jnp.float32)
    params["a1_w"], params["a1_b"] = lin(ks[1], emb_dim, hidden)
    params["a2_w"], params["a2_b"] = lin(ks[2], hidden, action_dim)
    params["c1_w"], params["c1_b"] = lin(ks[3], emb_dim, hidden)
    params["c2_w"], params["c2_b"] = lin(ks[4], hidden, 1)
    return params


def evaluate(params, state, action, action_dim, tile_b=256):
    """
    Pallas-backed BaselineActorCriticPPO.evaluate(state, action).

    state  : int32 (B,) indices into the embedding table
    action : int32 (B,) sampled actions
    returns (action_logprobs (B,), state_value (B,), entropy (B,), action_probs (B, A))
    """
    B = state.shape[0]
    state_dim = params["embedding"].shape[0]

    tile_b = min(tile_b, max(8, _round_up(B, 8)))
    b_pad = _round_up(B, tile_b)
    a_pad = _round_up(action_dim + 3, LANE)     # +3: logp / value / entropy lanes
    state_pad = _round_up(state_dim, LANE)

    # ---- pack / pad parameters (tiny; fuses into the surrounding jit) ----
    table = jnp.zeros((state_pad, EMB_DIM), jnp.float32).at[:state_dim].set(
        params["embedding"].astype(jnp.float32))
    w1 = jnp.concatenate([params["a1_w"], params["c1_w"]], axis=1)      # (64, 512)
    b1 = jnp.concatenate([params["a1_b"], params["c1_b"]], axis=1)      # (1, 512)
    w2 = jnp.zeros((2 * HIDDEN, a_pad), jnp.float32)
    w2 = w2.at[:HIDDEN, :action_dim].set(params["a2_w"])
    w2 = w2.at[HIDDEN:, action_dim].set(params["c2_w"][:, 0])
    b2 = jnp.zeros((1, a_pad), jnp.float32)
    b2 = b2.at[0, :action_dim].set(params["a2_b"][0])
    b2 = b2.at[0, action_dim].set(params["c2_b"][0, 0])

    state_i = jnp.zeros((b_pad, 1), jnp.int32).at[:B, 0].set(state.astype(jnp.int32))
    action_i = jnp.zeros((b_pad, 1), jnp.int32).at[:B, 0].set(action.astype(jnp.int32))

    grid = (b_pad // tile_b,)

    flops = 2 * b_pad * (state_pad * EMB_DIM + EMB_DIM * 2 * HIDDEN + 2 * HIDDEN * a_pad)
    bytes_accessed = 4 * (state_i.size + action_i.size + table.size + w1.size + b1.size
                          + w2.size + b2.size + b_pad * a_pad)
    cost = pl.CostEstimate(flops=flops,
                           transcendentals=b_pad * (a_pad + 2),
                           bytes_accessed=bytes_accessed)

    out = pl.pallas_call(
        _make_kernel(action_dim),
        out_shape=jax.ShapeDtypeStruct((b_pad, a_pad), jnp.float32),
        grid=grid,
        in_specs=[
            pl.BlockSpec((tile_b, 1), _batch_tile),           # state indices
            pl.BlockSpec((tile_b, 1), _batch_tile),           # action indices
            pl.BlockSpec((state_pad, EMB_DIM), _resident),    # embedding table (padded)
            pl.BlockSpec((EMB_DIM, 2 * HIDDEN), _resident),   # fused W1
            pl.BlockSpec((1, 2 * HIDDEN), _resident),         # fused b1
            pl.BlockSpec((2 * HIDDEN, a_pad), _resident),     # fused block-diag W2
            pl.BlockSpec((1, a_pad), _resident),              # fused b2
        ],
        out_specs=pl.BlockSpec((tile_b, a_pad), _batch_tile),
        compiler_params=pltpu.CompilerParams(dimension_semantics=("parallel",)),
        cost_estimate=cost,
    )(state_i, action_i, table, w1, b1, w2, b2)

    probs = out[:B, :action_dim]
    logp = out[:B, action_dim]
    value = out[:B, action_dim + 1]
    entropy = out[:B, action_dim + 2]
    return logp, value, entropy, probs


def _reference(params, state, action, action_dim):
    emb = params["embedding"][state]
    h = jax.nn.relu(emb @ params["a1_w"] + params["a1_b"])
    logits = h @ params["a2_w"] + params["a2_b"]
    probs = jax.nn.softmax(logits, axis=-1)
    logp_all = jax.nn.log_softmax(logits, axis=-1)
    logp = jnp.take_along_axis(logp_all, action[:, None], axis=-1)[:, 0]
    ent = -jnp.sum(probs * logp_all, axis=-1)
    hc = jax.nn.relu(emb @ params["c1_w"] + params["c1_b"])
    val = (hc @ params["c2_w"] + params["c2_b"])[:, 0]
    return logp, val, ent, probs


if __name__ == "__main__":
    STATE_DIM = 16     # vocabulary size of the embedding
    ACTION_DIM = 8
    BATCH = 8

    key = jax.random.PRNGKey(0)
    kp, ks, ka = jax.random.split(key, 3)

    params = init_params(kp, STATE_DIM, ACTION_DIM)
    state = jax.random.randint(ks, (BATCH,), 0, STATE_DIM, dtype=jnp.int32)
    action = jax.random.randint(ka, (BATCH,), 0, ACTION_DIM, dtype=jnp.int32)

    eval_fn = jax.jit(functools.partial(evaluate, action_dim=ACTION_DIM))
    logp, val, ent, probs = eval_fn(params, state, action)
    jax.block_until_ready((logp, val, ent, probs))

    # correctness check against pure-JAX reference
    r_logp, r_val, r_ent, r_probs = _reference(params, state, action, ACTION_DIM)
    assert jnp.allclose(logp, r_logp, atol=1e-4), "log_prob mismatch"
    assert jnp.allclose(val, r_val, atol=1e-4), "value mismatch"
    assert jnp.allclose(ent, r_ent, atol=1e-4), "entropy mismatch"
    assert jnp.allclose(probs, r_probs, atol=1e-4), "probs mismatch"

    print("KERNEL_OK")
</pallas_src>

<mosaic_0001>
module attributes {stable_mosaic.version = 11 : i64} {
  func.func @kernel(%arg0: i32, %arg1: memref<8x1xi32, #tpu.memory_space<vmem>>, %arg2: memref<8x1xi32, #tpu.memory_space<vmem>>, %arg3: memref<128x64xf32, #tpu.memory_space<vmem>>, %arg4: memref<64x512xf32, #tpu.memory_space<vmem>>, %arg5: memref<1x512xf32, #tpu.memory_space<vmem>>, %arg6: memref<512x128xf32, #tpu.memory_space<vmem>>, %arg7: memref<1x128xf32, #tpu.memory_space<vmem>>, %arg8: memref<8x128xf32, #tpu.memory_space<vmem>>) attributes {dimension_semantics = [#tpu.dimension_semantics<parallel>], iteration_bounds = array<i64: 1>, scalar_prefetch = 0 : i64, scratch_operands = 0 : i64, tpu.core_type = #tpu.core_type<tc>, window_params = [{transform_indices = @transform_0, window_bounds = array<i64: 8, 1>}, {transform_indices = @transform_1, window_bounds = array<i64: 8, 1>}, {pipeline_mode = #tpu.pipeline_mode<synchronous>, transform_indices = @transform_2, window_bounds = array<i64: 128, 64>}, {pipeline_mode = #tpu.pipeline_mode<synchronous>, transform_indices = @transform_3, window_bounds = array<i64: 64, 512>}, {pipeline_mode = #tpu.pipeline_mode<synchronous>, transform_indices = @transform_4, window_bounds = array<i64: 1, 512>}, {pipeline_mode = #tpu.pipeline_mode<synchronous>, transform_indices = @transform_5, window_bounds = array<i64: 512, 128>}, {pipeline_mode = #tpu.pipeline_mode<synchronous>, transform_indices = @transform_6, window_bounds = array<i64: 1, 128>}, {transform_indices = @transform_7, window_bounds = array<i64: 8, 128>}]} {
    %c0 = arith.constant 0 : index
    %c0_0 = arith.constant 0 : index
    %0 = vector.load %arg1[%c0, %c0_0] : memref<8x1xi32, #tpu.memory_space<vmem>>, vector<8x1xi32>
    %c0_1 = arith.constant 0 : index
    %c0_2 = arith.constant 0 : index
    %1 = vector.load %arg2[%c0_1, %c0_2] : memref<8x1xi32, #tpu.memory_space<vmem>>, vector<8x1xi32>
    %2 = tpu.iota {dimensions = array<i32: 1>} : vector<8x128xi32>
    %3 = vector.broadcast %0 : vector<8x1xi32> to vector<8x128xi32>
    %4 = arith.cmpi eq, %2, %3 : vector<8x128xi32>
    %cst = arith.constant 1.000000e+00 : f32
    %cst_3 = arith.constant 0.000000e+00 : f32
    %5 = vector.broadcast %cst : f32 to vector<8x128xf32>
    %6 = vector.broadcast %cst_3 : f32 to vector<8x128xf32>
    %7 = arith.select %4, %5, %6 : vector<8x128xi1>, vector<8x128xf32>
    %c0_4 = arith.constant 0 : index
    %c0_5 = arith.constant 0 : index
    %8 = vector.load %arg3[%c0_4, %c0_5] : memref<128x64xf32, #tpu.memory_space<vmem>>, vector<128x64xf32>
    %cst_6 = arith.constant dense<0.000000e+00> : vector<8x64xf32>
    %9 = tpu.matmul %7, %8, %cst_6 {dimension_numbers = #tpu.dot_dimension_numbers<[1], [0], [0], [1], [0, 0, 1, 1], [], []>} : vector<8x128xf32>, vector<128x64xf32>, vector<8x64xf32> -> vector<8x64xf32>
    %c0_7 = arith.constant 0 : index
    %c0_8 = arith.constant 0 : index
    %10 = vector.load %arg4[%c0_7, %c0_8] : memref<64x512xf32, #tpu.memory_space<vmem>>, vector<64x512xf32>
    %cst_9 = arith.constant dense<0.000000e+00> : vector<8x512xf32>
    %11 = tpu.matmul %9, %10, %cst_9 {dimension_numbers = #tpu.dot_dimension_numbers<[1], [0], [0], [1], [0, 0, 1, 1], [], []>} : vector<8x64xf32>, vector<64x512xf32>, vector<8x512xf32> -> vector<8x512xf32>
    %c0_10 = arith.constant 0 : index
    %c0_11 = arith.constant 0 : index
    %12 = vector.load %arg5[%c0_10, %c0_11] : memref<1x512xf32, #tpu.memory_space<vmem>>, vector<1x512xf32>
    %13 = vector.broadcast %12 : vector<1x512xf32> to vector<8x512xf32>
    %14 = arith.addf %11, %13 : vector<8x512xf32>
    %cst_12 = arith.constant 0.000000e+00 : f32
    %15 = vector.broadcast %cst_12 : f32 to vector<8x512xf32>
    %16 = arith.maximumf %14, %15 : vector<8x512xf32>
    %c0_13 = arith.constant 0 : index
    %c0_14 = arith.constant 0 : index
    %17 = vector.load %arg6[%c0_13, %c0_14] : memref<512x128xf32, #tpu.memory_space<vmem>>, vector<512x128xf32>
    %cst_15 = arith.constant dense<0.000000e+00> : vector<8x128xf32>
    %18 = tpu.matmul %16, %17, %cst_15 {dimension_numbers = #tpu.dot_dimension_numbers<[1], [0], [0], [1], [0, 0, 1, 1], [], []>} : vector<8x512xf32>, vector<512x128xf32>, vector<8x128xf32> -> vector<8x128xf32>
    %c0_16 = arith.constant 0 : index
    %c0_17 = arith.constant 0 : index
    %19 = vector.load %arg7[%c0_16, %c0_17] : memref<1x128xf32, #tpu.memory_space<vmem>>, vector<1x128xf32>
    %20 = vector.broadcast %19 : vector<1x128xf32> to vector<8x128xf32>
    %21 = arith.addf %18, %20 : vector<8x128xf32>
    %22 = tpu.iota {dimensions = array<i32: 1>} : vector<8x128xi32>
    %c8_i32 = arith.constant 8 : i32
    %23 = vector.broadcast %c8_i32 : i32 to vector<8x128xi32>
    %24 = arith.cmpi eq, %22, %23 : vector<8x128xi32>
    %cst_18 = arith.constant 0.000000e+00 : f32
    %25 = vector.broadcast %cst_18 : f32 to vector<8x128xf32>
    %26 = arith.select %24, %21, %25 : vector<8x128xi1>, vector<8x128xf32>
    %cst_19 = arith.constant dense<0.000000e+00> : vector<8xf32>
    %27 = vector.multi_reduction <add>, %26, %cst_19 [1] : vector<8x128xf32> to vector<8xf32>
    %28 = vector.shape_cast %27 : vector<8xf32> to vector<8x1xf32>
    %c8_i32_20 = arith.constant 8 : i32
    %29 = vector.broadcast %c8_i32_20 : i32 to vector<8x128xi32>
    %30 = arith.cmpi slt, %22, %29 : vector<8x128xi32>
    %cst_21 = arith.constant -1.000000e+30 : f32
    %31 = vector.broadcast %cst_21 : f32 to vector<8x128xf32>
    %32 = arith.select %30, %21, %31 : vector<8x128xi1>, vector<8x128xf32>
    %cst_22 = arith.constant dense<0xFF800000> : vector<8xf32>
    %33 = vector.multi_reduction <maximumf>, %32, %cst_22 [1] : vector<8x128xf32> to vector<8xf32>
    %34 = vector.shape_cast %33 : vector<8xf32> to vector<8x1xf32>
    %35 = vector.broadcast %34 : vector<8x1xf32> to vector<8x128xf32>
    %36 = arith.subf %32, %35 : vector<8x128xf32>
    %37 = math.exp %36 : vector<8x128xf32>
    %cst_23 = arith.constant dense<0.000000e+00> : vector<8xf32>
    %38 = vector.multi_reduction <add>, %37, %cst_23 [1] : vector<8x128xf32> to vector<8xf32>
    %39 = vector.shape_cast %38 : vector<8xf32> to vector<8x1xf32>
    %40 = math.log %39 : vector<8x1xf32>
    %41 = vector.broadcast %40 : vector<8x1xf32> to vector<8x128xf32>
    %42 = arith.subf %36, %41 : vector<8x128xf32>
    %43 = tpu.reciprocal %39 : vector<8x1xf32> -> vector<8x1xf32>
    %44 = vector.broadcast %43 : vector<8x1xf32> to vector<8x128xf32>
    %45 = arith.mulf %37, %44 : vector<8x128xf32>
    %46 = vector.broadcast %1 : vector<8x1xi32> to vector<8x128xi32>
    %47 = arith.cmpi eq, %22, %46 : vector<8x128xi32>
    %cst_24 = arith.constant 0.000000e+00 : f32
    %48 = vector.broadcast %cst_24 : f32 to vector<8x128xf32>
    %49 = arith.select %47, %42, %48 : vector<8x128xi1>, vector<8x128xf32>
    %cst_25 = arith.constant dense<0.000000e+00> : vector<8xf32>
    %50 = vector.multi_reduction <add>, %49, %cst_25 [1] : vector<8x128xf32> to vector<8xf32>
    %51 = vector.shape_cast %50 : vector<8xf32> to vector<8x1xf32>
    %52 = arith.mulf %45, %42 : vector<8x128xf32>
    %cst_26 = arith.constant dense<0.000000e+00> : vector<8xf32>
    %53 = vector.multi_reduction <add>, %52, %cst_26 [1] : vector<8x128xf32> to vector<8xf32>
    %54 = vector.shape_cast %53 : vector<8xf32> to vector<8x1xf32>
    %cst_27 = arith.constant 0.000000e+00 : f32
    %55 = vector.broadcast %cst_27 : f32 to vector<8x1xf32>
    %56 = arith.subf %55, %54 : vector<8x1xf32>
    %c8_i32_28 = arith.constant 8 : i32
    %57 = vector.broadcast %c8_i32_28 : i32 to vector<8x128xi32>
    %58 = arith.cmpi eq, %22, %57 : vector<8x128xi32>
    %59 = vector.shape_cast %51 : vector<8x1xf32> to vector<8x1xf32>
    %60 = vector.broadcast %59 : vector<8x1xf32> to vector<8x128xf32>
    %61 = arith.select %58, %60, %45 : vector<8x128xi1>, vector<8x128xf32>
    %c9_i32 = arith.constant 9 : i32
    %62 = vector.broadcast %c9_i32 : i32 to vector<8x128xi32>
    %63 = arith.cmpi eq, %22, %62 : vector<8x128xi32>
    %64 = vector.shape_cast %28 : vector<8x1xf32> to vector<8x1xf32>
    %65 = vector.broadcast %64 : vector<8x1xf32> to vector<8x128xf32>
    %66 = arith.select %63, %65, %61 : vector<8x128xi1>, vector<8x128xf32>
    %c10_i32 = arith.constant 10 : i32
    %67 = vector.broadcast %c10_i32 : i32 to vector<8x128xi32>
    %68 = arith.cmpi eq, %22, %67 : vector<8x128xi32>
    %69 = vector.shape_cast %56 : vector<8x1xf32> to vector<8x1xf32>
    %70 = vector.broadcast %69 : vector<8x1xf32> to vector<8x128xf32>
    %71 = arith.select %68, %70, %66 : vector<8x128xi1>, vector<8x128xf32>
    %c0_29 = arith.constant 0 : index
    %c0_30 = arith.constant 0 : index
    %72 = vector.load %arg8[%c0_29, %c0_30] : memref<8x128xf32, #tpu.memory_space<vmem>>, vector<8x128xf32>
    tpu.vector_store %arg8[%c0_29, %c0_30], %71 {strides = array<i32>} : memref<8x128xf32, #tpu.memory_space<vmem>>, vector<8x128xf32>,
    return
  }
  func.func @transform_0(%arg0: i32) -> (i32, i32) {
    %c0_i32 = arith.constant 0 : i32
    %c0_i32_0 = arith.constant 0 : i32
    return %arg0, %c0_i32 : i32, i32
  }
  func.func @transform_1(%arg0: i32) -> (i32, i32) {
    %c0_i32 = arith.constant 0 : i32
    %c0_i32_0 = arith.constant 0 : i32
    return %arg0, %c0_i32 : i32, i32
  }
  func.func @transform_2(%arg0: i32) -> (i32, i32) {
    %c0_i32 = arith.constant 0 : i32
    %c0_i32_0 = arith.constant 0 : i32
    %c0_i32_1 = arith.constant 0 : i32
    return %c0_i32, %c0_i32_0 : i32, i32
  }
  func.func @transform_3(%arg0: i32) -> (i32, i32) {
    %c0_i32 = arith.constant 0 : i32
    %c0_i32_0 = arith.constant 0 : i32
    %c0_i32_1 = arith.constant 0 : i32
    return %c0_i32, %c0_i32_0 : i32, i32
  }
  func.func @transform_4(%arg0: i32) -> (i32, i32) {
    %c0_i32 = arith.constant 0 : i32
    %c0_i32_0 = arith.constant 0 : i32
    %c0_i32_1 = arith.constant 0 : i32
    return %c0_i32, %c0_i32_0 : i32, i32
  }
  func.func @transform_5(%arg0: i32) -> (i32, i32) {
    %c0_i32 = arith.constant 0 : i32
    %c0_i32_0 = arith.constant 0 : i32
    %c0_i32_1 = arith.constant 0 : i32
    return %c0_i32, %c0_i32_0 : i32, i32
  }
  func.func @transform_6(%arg0: i32) -> (i32, i32) {
    %c0_i32 = arith.constant 0 : i32
    %c0_i32_0 = arith.constant 0 : i32
    %c0_i32_1 = arith.constant 0 : i32
    return %c0_i32, %c0_i32_0 : i32, i32
  }
  func.func @transform_7(%arg0: i32) -> (i32, i32) {
    %c0_i32 = arith.constant 0 : i32
    %c0_i32_0 = arith.constant 0 : i32
    return %arg0, %c0_i32 : i32, i32
  }
}

</mosaic_0001>

<bundles_post_ra>
// kernel: evaluate.1
= control target key start
LH: loop header
LB: loop body
LE: loop exit
PB: predicated region body
PF: predicated region fallthrough
CT: control target
= control target key end

     0   :  { %v834_v0 = vmov 0   ;;  %v835_v2 = vmov 0.0|0.0   ;;  %vm836_vm0 = vmmov 0   ;;  %v837_v8 = vmov 0.0   ;;  %s1253_s0 = inlined_call_operand.vmem [shape: s32[8,1], index: 0, kind: input, shape index: {}]   ;;  %s1254_s2 = inlined_call_operand.vmem [shape: f32[128,64], index: 2, kind: input, shape index: {}]   ;;  %s1255_s3 = inlined_call_operand.vmem [shape: f32[64,512], index: 3, kind: input, shape index: {}]   ;;  %s1256_s5 = inlined_call_operand.vmem [shape: f32[512,128], index: 5, kind: input, shape index: {}]   ;;  %s1257_s4 = inlined_call_operand.vmem [shape: f32[1,512], index: 4, kind: input, shape index: {}]   ;;  %s1258_s6 = inlined_call_operand.vmem [shape: f32[1,128], index: 6, kind: input, shape index: {}]   ;;  %s1259_s1 = inlined_call_operand.vmem [shape: s32[8,1], index: 1, kind: input, shape index: {}]   ;;  %s1260_s7 = inlined_call_operand.vmem [shape: f32[8,128], index: 7, kind: output, shape index: {}]  }
   0x1   :  { %826 = vset.pattern.permute.xlu0 %v834_v0  ;;  %v26_v1 = vld [vmem:[%s1253_s0] sm:$0xff]  ;;  %701 = vmatprep.subr.bf16.mxu0 %v835_v2  ;;  %v36_v4 = vld [vmem:[%s1254_s2 + $0x8] sm:$0xff]  ;;  %v37_v6 = vld [vmem:[%s1254_s2 + $0x10] sm:$0xff]  ;;  %v28_v52 = vlaneseq  ;;  %v838_v55 = vmov 1.0   ;;  %vm175_vm2 = vcmask 523264  }
   0x2   :  { %v35_v3 = vld [vmem:[%s1254_s2] sm:$0xff]  ;;  %31 = vperm.xlu0 %826, %v26_v1   ;;  %v38_v7 = vld [vmem:[%s1254_s2 + $0x18] sm:$0xff]  ;;  %698 = vmatprep.mubr.msk.f32.mxu0 %vm836_vm0, %v837_v8  ;;  %v40_v11 = vld [vmem:[%s1254_s2 + $0x28] sm:$0xff] }
   0x3   :  { %v702_v5 = vpack.c.bf16 %v36_v4, %v35_v3  ;;  %243 = vmatprep.mubr.f32.mxu1 %v837_v8  ;;  %827 = vset.pattern.permute.xlu1 %v834_v0  ;;  %v705_v9 = vpack.c.bf16 %v38_v7, %v37_v6  ;;  %v39_v10 = vld [vmem:[%s1254_s2 + $0x20] sm:$0xff]  ;;  %v122_v12 = vld [vmem:[%s1255_s3 + $0x8] sm:$0xff]  ;;  %v41_v13 = vld [vmem:[%s1254_s2 + $0x30] sm:$0xff]  ;;  %v989_v53 = vand.u32 127, %v28_v52 }
   0x4   :  { %v42_v14 = vld [vmem:[%s1254_s2 + $0x38] sm:$0xff]  ;;  %v126_v15 = vld [vmem:[%s1255_s3 + $0x28] sm:$0xff]  ;;  %v121_v16 = vld [vmem:[%s1255_s3] sm:$0xff]  ;;  %v708_v18 = vpack.c.bf16 %v40_v11, %v39_v10 }
   0x5   :  { %703 = vmatpush3.bf16.msra.mxu0 %v702_v5  ;;  %v125_v17 = vld [vmem:[%s1255_s3 + $0x20] sm:$0xff]  ;;  %v725_v19 = vpack.c.bf16 %v126_v15, %v122_v12  ;;  %v130_v21 = vld [vmem:[%s1255_s3 + $0x48] sm:$0xff]  ;;  %v711_v29 = vpack.c.bf16 %v42_v14, %v41_v13  ;;  %v45_v42 = vld [vmem:[%s1254_s2 + $0x50] sm:$0xff]  ;;  %vm540_vm3 = vcmp.lt.s32.totalorder %v989_v53, 8  ;;  %vm536_vm5 = vcmp.eq.s32.totalorder %v989_v53, 8 }
   0x6   :  { %704 = vmatprep.subr.bf16.mxu0 %v835_v2  ;;  %v727_v20 = vpack.c.bf16 %v125_v17, %v121_v16  ;;  %v134_v22 = vld [vmem:[%s1255_s3 + $0x68] sm:$0xff]  ;;  %v129_v23 = vld [vmem:[%s1255_s3 + $0x40] sm:$0xff]  ;;  %v46_v43 = vld [vmem:[%s1254_s2 + $0x58] sm:$0xff]  ;;  %vm566_vm6 = vcmp.eq.s32.totalorder %v989_v53, 9  ;;  %vm568_vm7 = vcmp.eq.s32.totalorder %v989_v53, 10 }
   0x7   :  { %v729_v24 = vpack.c.bf16 %v134_v22, %v130_v21  ;;  %v133_v25 = vld [vmem:[%s1255_s3 + $0x60] sm:$0xff]  ;;  %v138_v26 = vld [vmem:[%s1255_s3 + $0x88] sm:$0xff]  ;;  %726 = vmatprep.subr.bf16.mxu1 %v725_v19  ;;  %v717_v45 = vpack.c.bf16 %v46_v43, %v45_v42  ;;  %v49_v49 = vld [vmem:[%s1254_s2 + $0x70] sm:$0xff] }
   0x8   :  { %v142_v27 = vld [vmem:[%s1255_s3 + $0xa8] sm:$0xff]  ;;  %728 = vmatpush1.bf16.msra.mxu1 %v727_v20  ;;  %v731_v28 = vpack.c.bf16 %v133_v25, %v129_v23  ;;  %v43_v30 = vld [vmem:[%s1254_s2 + $0x40] sm:$0xff]  ;;  %v50_v50 = vld [vmem:[%s1254_s2 + $0x78] sm:$0xff] }
   0x9   :  { %706 = vmatpush3.bf16.msra.mxu0 %v705_v9  ;;  %730 = vmatprep.subr.bf16.mxu1 %v729_v24  ;;  %v733_v31 = vpack.c.bf16 %v142_v27, %v138_v26  ;;  %v137_v32 = vld [vmem:[%s1255_s3 + $0x80] sm:$0xff]  ;;  %v44_v34 = vld [vmem:[%s1254_s2 + $0x48] sm:$0xff]  ;;  %v723_v51 = vpack.c.bf16 %v50_v50, %v49_v49  ;;  %v124_v56 = vld [vmem:[%s1255_s3 + $0x18] sm:$0xff] }
   0xa   :  { %707 = vmatprep.subr.bf16.mxu0 %v835_v2  ;;  %v141_v33 = vld [vmem:[%s1255_s3 + $0xa0] sm:$0xff]  ;;  %v146_v35 = vld [vmem:[%s1255_s3 + $0xc8] sm:$0xff]  ;;  %v714_v38 = vpack.c.bf16 %v44_v34, %v43_v30  ;;  %v128_v57 = vld [vmem:[%s1255_s3 + $0x38] sm:$0xff] }
   0xb   :  { %v150_v36 = vld [vmem:[%s1255_s3 + $0xe8] sm:$0xff]  ;;  %v735_v37 = vpack.c.bf16 %v141_v33, %v137_v32  ;;  %v145_v40 = vld [vmem:[%s1255_s3 + $0xc0] sm:$0xff]  ;;  %v741_v58 = vpack.c.bf16 %v128_v57, %v124_v56  ;;  %v343_v0 = vld [vmem:[%s1256_s5 + $0x90] sm:$0xff] }
   0xc   :  { %732 = vmatpush1.bf16.msra.mxu1 %v731_v28  ;;  %v737_v39 = vpack.c.bf16 %v150_v36, %v146_v35  ;;  %v149_v41 = vld [vmem:[%s1255_s3 + $0xe0] sm:$0xff]  ;;  %v48_v47 = vld [vmem:[%s1254_s2 + $0x68] sm:$0xff]  ;;  %v344_v1 = vld [vmem:[%s1256_s5 + $0x98] sm:$0xff] }
   0xd   :  { %709 = vmatpush3.bf16.msra.mxu0 %v708_v18  ;;  %734 = vmatprep.subr.bf16.mxu1 %v733_v31  ;;  %v739_v44 = vpack.c.bf16 %v149_v41, %v145_v40  ;;  %v47_v46 = vld [vmem:[%s1254_s2 + $0x60] sm:$0xff]  ;;  %v342_v60 = vld [vmem:[%s1256_s5 + $0x88] sm:$0xff]  ;;  %v761_v3 = vpack.c.bf16 %v344_v1, %v343_v0  ;;  %v327_v4 = vld [vmem:[%s1256_s5 + $0x10] sm:$0xff] }
   0xe   :  { %710 = vmatprep.subr.bf16.mxu0 %v835_v2  ;;  %v720_v48 = vpack.c.bf16 %v48_v47, %v47_v46  ;;  %v341_v59 = vld [vmem:[%s1256_s5 + $0x80] sm:$0xff]  ;;  %v326_v63 = vld [vmem:[%s1256_s5 + $0x8] sm:$0xff]  ;;  %v328_v5 = vld [vmem:[%s1256_s5 + $0x18] sm:$0xff] }
   0xf   :  { %v325_v61 = vld [vmem:[%s1256_s5] sm:$0xff]  ;;  %v757_v62 = vpack.c.bf16 %v342_v60, %v341_v59  ;;  %v346_v7 = vld [vmem:[%s1256_s5 + $0xa8] sm:$0xff]  ;;  %v763_v9 = vpack.c.bf16 %v328_v5, %v327_v4  ;;  %v347_v13 = vld [vmem:[%s1256_s5 + $0xb0] sm:$0xff] }
  0x10   :  { %736 = vmatpush1.bf16.msra.mxu1 %v735_v37  ;;  %v345_v6 = vld [vmem:[%s1256_s5 + $0xa0] sm:$0xff]  ;;  %v330_v12 = vld [vmem:[%s1256_s5 + $0x28] sm:$0xff]  ;;  %v348_v14 = vld [vmem:[%s1256_s5 + $0xb8] sm:$0xff] }
  0x11   :  { %712 = vmatpush3.bf16.msra.mxu0 %v711_v29  ;;  %738 = vmatprep.subr.bf16.mxu1 %v737_v39  ;;  %v765_v10 = vpack.c.bf16 %v346_v7, %v345_v6  ;;  %v329_v11 = vld [vmem:[%s1256_s5 + $0x20] sm:$0xff]  ;;  %v769_v16 = vpack.c.bf16 %v348_v14, %v347_v13  ;;  %v331_v17 = vld [vmem:[%s1256_s5 + $0x30] sm:$0xff]  ;;  %v332_v18 = vld [vmem:[%s1256_s5 + $0x38] sm:$0xff] }
  0x12   :  { %713 = vmatprep.subr.bf16.mxu0 %v835_v2  ;;  %v767_v15 = vpack.c.bf16 %v330_v12, %v329_v11  ;;  %v349_v19 = vld [vmem:[%s1256_s5 + $0xc0] sm:$0xff]  ;;  %v350_v20 = vld [vmem:[%s1256_s5 + $0xc8] sm:$0xff]  ;;  %v771_v21 = vpack.c.bf16 %v332_v18, %v331_v17  ;;  %v351_v25 = vld [vmem:[%s1256_s5 + $0xd0] sm:$0xff] }
  0x13   :  { %v773_v22 = vpack.c.bf16 %v350_v20, %v349_v19  ;;  %v333_v23 = vld [vmem:[%s1256_s5 + $0x40] sm:$0xff]  ;;  %v334_v24 = vld [vmem:[%s1256_s5 + $0x48] sm:$0xff]  ;;  %v352_v26 = vld [vmem:[%s1256_s5 + $0xd8] sm:$0xff] }
  0x14   :  { %740 = vmatpush1.bf16.msra.mxu1 %v739_v44  ;;  %v775_v27 = vpack.c.bf16 %v334_v24, %v333_v23  ;;  %v777_v28 = vpack.c.bf16 %v352_v26, %v351_v25  ;;  %v335_v29 = vld [vmem:[%s1256_s5 + $0x50] sm:$0xff]  ;;  %v336_v30 = vld [vmem:[%s1256_s5 + $0x58] sm:$0xff]  ;;  %v353_v31 = vld [vmem:[%s1256_s5 + $0xe0] sm:$0xff] }
  0x15   :  { %715 = vmatpush3.bf16.msra.mxu0 %v714_v38  ;;  %742 = vmatprep.subr.bf16.mxu1 %v741_v58  ;;  %v354_v32 = vld [vmem:[%s1256_s5 + $0xe8] sm:$0xff]  ;;  %v779_v33 = vpack.c.bf16 %v336_v30, %v335_v29  ;;  %v123_v35 = vld [vmem:[%s1255_s3 + $0x10] sm:$0xff]  ;;  %v132_v37 = vld [vmem:[%s1255_s3 + $0x58] sm:$0xff] }
  0x16   :  { %716 = vmatprep.subr.bf16.mxu0 %v835_v2  ;;  %v781_v34 = vpack.c.bf16 %v354_v32, %v353_v31  ;;  %v127_v36 = vld [vmem:[%s1255_s3 + $0x30] sm:$0xff]  ;;  %v136_v38 = vld [vmem:[%s1255_s3 + $0x78] sm:$0xff]  ;;  %v373_v58 = vld [vmem:[%s1256_s5 + $0x180] sm:$0xff] }
  0x17   :  { %v743_v39 = vpack.c.bf16 %v127_v36, %v123_v35  ;;  %v745_v40 = vpack.c.bf16 %v136_v38, %v132_v37  ;;  %v131_v41 = vld [vmem:[%s1255_s3 + $0x50] sm:$0xff]  ;;  %v140_v44 = vld [vmem:[%s1255_s3 + $0x98] sm:$0xff]  ;;  %v374_v59 = vld [vmem:[%s1256_s5 + $0x188] sm:$0xff] }
  0x18   :  { %v135_v42 = vld [vmem:[%s1255_s3 + $0x70] sm:$0xff]  ;;  %v376_v1 = vld [vmem:[%s1256_s5 + $0x198] sm:$0xff]  ;;  %v377_v6 = vld [vmem:[%s1256_s5 + $0x1a0] sm:$0xff] }
  0x19   :  { %718 = vmatpush3.bf16.msra.mxu0 %v717_v45  ;;  %v144_v45 = vld [vmem:[%s1255_s3 + $0xb8] sm:$0xff]  ;;  %v747_v47 = vpack.c.bf16 %v135_v42, %v131_v41  ;;  %v139_v49 = vld [vmem:[%s1255_s3 + $0x90] sm:$0xff]  ;;  %v378_v7 = vld [vmem:[%s1256_s5 + $0x1a8] sm:$0xff] }
  0x1a   :  { %719 = vmatprep.subr.bf16.mxu0 %v835_v2  ;;  %v143_v50 = vld [vmem:[%s1255_s3 + $0xb0] sm:$0xff]  ;;  %v360_v5 = vld [vmem:[%s1256_s5 + $0x118] sm:$0xff]  ;;  %v361_v11 = vld [vmem:[%s1256_s5 + $0x120] sm:$0xff] }
  0x1b   :  { %v147_v56 = vld [vmem:[%s1255_s3 + $0xd0] sm:$0xff]  ;;  %v362_v12 = vld [vmem:[%s1256_s5 + $0x128] sm:$0xff]  ;;  %v337_v14 = vld [vmem:[%s1256_s5 + $0x60] sm:$0xff] }
  0x1c   :  { %v151_v57 = vld [vmem:[%s1255_s3 + $0xf0] sm:$0xff]  ;;  %v799_v13 = vpack.c.bf16 %v362_v12, %v361_v11  ;;  %v380_v18 = vld [vmem:[%s1256_s5 + $0x1b8] sm:$0xff]  ;;  %v381_v29 = vld [vmem:[%s1256_s5 + $0x1c0] sm:$0xff] }
  0x1d   :  { %721 = vmatpush3.bf16.msra.mxu0 %v720_v48  ;;  %v749_v48 = vpack.c.bf16 %v144_v45, %v140_v44  ;;  %v755_v60 = vpack.c.bf16 %v151_v57, %v147_v56  ;;  %v375_v0 = vld [vmem:[%s1256_s5 + $0x190] sm:$0xff]  ;;  %v364_v24 = vld [vmem:[%s1256_s5 + $0x138] sm:$0xff]  ;;  %v382_v30 = vld [vmem:[%s1256_s5 + $0x1c8] sm:$0xff] }
  0x1e   :  { %722 = vmatprep.subr.bf16.mxu0 %v835_v2  ;;  %v759_v2 = vpack.c.bf16 %v326_v63, %v325_v61  ;;  %v789_v61 = vpack.c.bf16 %v374_v59, %v373_v58  ;;  %v358_v63 = vld [vmem:[%s1256_s5 + $0x108] sm:$0xff]  ;;  %v359_v4 = vld [vmem:[%s1256_s5 + $0x110] sm:$0xff]  ;;  %v340_v26 = vld [vmem:[%s1256_s5 + $0x78] sm:$0xff]  ;;  %v805_v31 = vpack.c.bf16 %v382_v30, %v381_v29 }
  0x1f   :  { %v379_v17 = vld [vmem:[%s1256_s5 + $0x1b0] sm:$0xff]  ;;  %v365_v32 = vld [vmem:[%s1256_s5 + $0x140] sm:$0xff]  ;;  %v384_v36 = vld [vmem:[%s1256_s5 + $0x1d8] sm:$0xff] }
  0x20   :  { %v801_v19 = vpack.c.bf16 %v380_v18, %v379_v17  ;;  %v355_v20 = vld [vmem:[%s1256_s5 + $0xf0] sm:$0xff]  ;;  %v386_v41 = vld [vmem:[%s1256_s5 + $0x1e8] sm:$0xff]  ;;  %v369_v44 = vld [vmem:[%s1256_s5 + $0x160] sm:$0xff] }
  0x21   :  { %724 = vmatpush3.bf16.msra.mxu0 %v723_v51  ;;  %v148_v51 = vld [vmem:[%s1255_s3 + $0xd8] sm:$0xff]  ;;  %v339_v25 = vld [vmem:[%s1256_s5 + $0x70] sm:$0xff]  ;;  %v370_v45 = vld [vmem:[%s1256_s5 + $0x168] sm:$0xff] }
  0x22   :  { %758 = vmatprep.subr.bf16.mxu0 %v757_v62  ;;  %v357_v62 = vld [vmem:[%s1256_s5 + $0x100] sm:$0xff]  ;;  %v383_v35 = vld [vmem:[%s1256_s5 + $0x1d0] sm:$0xff] }
  0x23   :  { %v367_v37 = vld [vmem:[%s1256_s5 + $0x150] sm:$0xff]  ;;  %v809_v38 = vpack.c.bf16 %v384_v36, %v383_v35  ;;  %v153_v56 = vld [vmem:[%s1257_s4] sm:$0xf] }
  0x81   :  { %v32_v54 = vpop.permute.xlu0 %31 }
  0x82   :  { %vm33_vm1 = vcmp.eq.s32.totalorder %v989_v53, %v32_v54  ;;  %v152_v54 = vld [vmem:[%s1255_s3 + $0xf8] sm:$0xff] }
  0x83   :  { %699 = vmatmul.mubr.msk.f32.vlgmr.msra.gmra.mrb[0].mxu0 %vm33_vm1, %v838_v55  ;;  %v753_v55 = vpack.c.bf16 %v152_v54, %v148_v51  ;;  %v372_v51 = vld [vmem:[%s1256_s5 + $0x178] sm:$0xff] }
  0x84   :  { %760 = vmatpush3.bf16.msra.mxu0 %v759_v2  ;;  %v791_v2 = vpack.c.bf16 %v358_v63, %v357_v62 }
  0x85   :  { %762 = vmatprep.subr.bf16.mxu0 %v761_v3  ;;  %v793_v3 = vpack.c.bf16 %v376_v1, %v375_v0 }
  0x88   :  { %764 = vmatpush3.bf16.msra.mxu0 %v763_v9  ;;  %v795_v9 = vpack.c.bf16 %v360_v5, %v359_v4 }
  0x89   :  { %766 = vmatprep.subr.bf16.mxu0 %v765_v10  ;;  %v797_v10 = vpack.c.bf16 %v378_v7, %v377_v6 }
  0x8c   :  { %768 = vmatpush3.bf16.msra.mxu0 %v767_v15  ;;  %v338_v15 = vld [vmem:[%s1256_s5 + $0x68] sm:$0xff] }
  0x8d   :  { %770 = vmatprep.subr.bf16.mxu0 %v769_v16  ;;  %v783_v16 = vpack.c.bf16 %v338_v15, %v337_v14  ;;  %v578_v15 = vld [vmem:[%s1258_s6] ss:$0 sm:$0xff] }
  0x90   :  { %772 = vmatpush3.bf16.msra.mxu0 %v771_v21  ;;  %v356_v21 = vld [vmem:[%s1256_s5 + $0xf8] sm:$0xff] }
  0x91   :  { %774 = vmatprep.subr.bf16.mxu0 %v773_v22  ;;  %v363_v22 = vld [vmem:[%s1256_s5 + $0x130] sm:$0xff]  ;;  %v785_v23 = vpack.c.bf16 %v356_v21, %v355_v20 }
  0x94   :  { %776 = vmatpush3.bf16.msra.mxu0 %v775_v27  ;;  %v803_v27 = vpack.c.bf16 %v364_v24, %v363_v22 }
  0x95   :  { %778 = vmatprep.subr.bf16.mxu0 %v777_v28  ;;  %v787_v28 = vpack.c.bf16 %v340_v26, %v339_v25  ;;  %v27_v26 = vld [vmem:[%s1259_s1] sm:$0xff] }
  0x98   :  { %780 = vmatpush3.bf16.msra.mxu0 %v779_v33  ;;  %v366_v33 = vld [vmem:[%s1256_s5 + $0x148] sm:$0xff] }
  0x99   :  { %782 = vmatprep.subr.bf16.mxu0 %v781_v34  ;;  %v807_v34 = vpack.c.bf16 %v366_v33, %v365_v32 }
  0x9c   :  { %784 = vmatpush3.bf16.msra.mxu0 %v783_v16 }
  0x9d   :  { %786 = vmatprep.subr.bf16.mxu0 %v785_v23 }
  0xa0   :  { %788 = vmatpush3.bf16.msra.mxu0 %v787_v28 }
 0x156   :  { %v117_v43 = vpop.f32.mrb[0].mxu0 }
 0x157   :  { %v700_v46 = vpop.f32.mrb[1].mxu0  ;;  %576 = vmatmul.mubr.msk.f32.vlgmr.msra.gmra.mrb[0].mxu1 %vm175_vm2, %v117_v43 }
 0x158   :  { %744 = vmatpush1.bf16.msra.mxu1 %v743_v39  ;;  %314 = vmatprep.mubr.f32.mxu1 %v837_v8  ;;  %v751_v8 = vpack.c.bf16 %v143_v50, %v139_v49  ;;  %v368_v39 = vld [vmem:[%s1256_s5 + $0x158] sm:$0xff]  ;;  %v815_v46 = vpack.c.bf16 %v370_v45, %v369_v44  ;;  %v371_v50 = vld [vmem:[%s1256_s5 + $0x170] sm:$0xff] }
 0x159   :  { %746 = vmatprep.subr.bf16.mxu1 %v745_v40  ;;  %v385_v40 = vld [vmem:[%s1256_s5 + $0x1e0] sm:$0xff]  ;;  %v811_v42 = vpack.c.bf16 %v368_v39, %v367_v37  ;;  %v819_v54 = vpack.c.bf16 %v372_v51, %v371_v50 }
 0x15c   :  { %748 = vmatpush1.bf16.msra.mxu1 %v747_v47  ;;  %v387_v47 = vld [vmem:[%s1256_s5 + $0x1f0] sm:$0xff] }
 0x15d   :  { %750 = vmatprep.subr.bf16.mxu1 %v749_v48  ;;  %v388_v48 = vld [vmem:[%s1256_s5 + $0x1f8] sm:$0xff] }
 0x15e   :  { %v817_v49 = vpack.c.bf16 %v388_v48, %v387_v47 }
 0x160   :  { %752 = vmatpush1.bf16.msra.mxu1 %v751_v8  ;;  %v156_v8 = vshrl.u32 %v28_v52, 7 }
 0x161   :  { %754 = vmatprep.subr.bf16.mxu1 %v753_v55 }
 0x162   :  { %v157_v55 = vsub.s32 0, %v156_v8  ;;  %v161_v57 = vsub.s32 1, %v156_v8 }
 0x164   :  { %756 = vmatpush1.bf16.msra.mxu1 %v755_v60  ;;  %v158_v58 = vrot.slane %v153_v56, %v157_v55  ;;  %v162_v59 = vrot.slane %v153_v56, %v161_v57 }
 0x165   :  { %790 = vmatprep.subr.bf16.mxu1 %v789_v61 }
 0x167   :  { %577 = vmatmul.mubr.msk.f32.vlgmr.msra.gmra.mrb[2].mxu1 %vm175_vm2, %v117_v43  ;;  %v813_v43 = vpack.c.bf16 %v386_v41, %v385_v40 }
 0x168   :  { %792 = vmatpush3.bf16.msra.mxu1 %v791_v2  ;;  %v165_v2 = vsub.s32 2, %v156_v8 }
 0x169   :  { %794 = vmatprep.subr.bf16.mxu1 %v793_v3  ;;  %v169_v3 = vsub.s32 3, %v156_v8 }
 0x16a   :  { %v166_v4 = vrot.slane %v153_v56, %v165_v2 }
 0x16b   :  { %v170_v52 = vrot.slane %v153_v56, %v169_v3 }
 0x16c   :  { %796 = vmatpush3.bf16.msra.mxu1 %v795_v9 }
 0x16d   :  { %798 = vmatprep.subr.bf16.mxu1 %v797_v10 }
 0x170   :  { %800 = vmatpush3.bf16.msra.mxu1 %v799_v13 }
 0x171   :  { %802 = vmatprep.subr.bf16.mxu1 %v801_v19 }
 0x174   :  { %804 = vmatpush3.bf16.msra.mxu1 %v803_v27 }
 0x175   :  { %806 = vmatprep.subr.bf16.mxu1 %v805_v31 }
 0x178   :  { %808 = vmatpush3.bf16.msra.mxu1 %v807_v34 }
 0x179   :  { %810 = vmatprep.subr.bf16.mxu1 %v809_v38 }
 0x17c   :  { %812 = vmatpush3.bf16.msra.mxu1 %v811_v42 }
 0x17d   :  { %814 = vmatprep.subr.bf16.mxu1 %v813_v43 }
 0x180   :  { %816 = vmatpush3.bf16.msra.mxu1 %v815_v46 }
 0x181   :  { %818 = vmatprep.subr.bf16.mxu1 %v817_v49 }
 0x184   :  { %820 = vmatpush3.bf16.msra.mxu1 %v819_v54 }
 0x22a   :  { %v245_v60 = vpop.f32.mrb[0].mxu1 }
 0x22b   :  { %v246_v61 = vadd.f32 %v245_v60, %v158_v58  ;;  %v247_v62 = vpop.f32.mrb[1].mxu1 }
 0x22c   :  { %v248_v63 = vadd.f32 %v247_v62, %v162_v59 }
 0x22d   :  { %v321_v1 = vmax.f32 %v246_v61, 0.0 }
 0x22e   :  { %v322_v0 = vmax.f32 %v248_v63, 0.0 }
 0x230   :  { %460 = vmatprep.mubr.f32.mxu0 %v322_v0 }
 0x231   :  { %461 = vmatmul.mubr.f32.vlgmr.msra.gmra.mrb[2].mxu0 %v321_v1 }
 0x23a   :  { %v316_v5 = vpop.f32.mrb[2].mxu1 }
 0x23b   :  { %v317_v6 = vadd.f32 %v316_v5, %v166_v4  ;;  %v318_v7 = vpop.f32.mrb[3].mxu1 }
 0x23c   :  { %v319_v9 = vadd.f32 %v318_v7, %v170_v52 }
 0x23d   :  { %v323_v11 = vmax.f32 %v317_v6, 0.0 }
 0x23e   :  { %v324_v10 = vmax.f32 %v319_v9, 0.0 }
 0x240   :  { %530 = vmatprep.mubr.f32.mxu1 %v324_v10 }
 0x241   :  { %531 = vmatmul.mubr.f32.vlgmr.msra.gmra.mrb[4].mxu1 %v323_v11 }
 0x304   :  { %v628_v12 = vpop.f32.mrb[2].mxu0 }
 0x305   :  { %v629_v13 = vpop.f32.mrb[3].mxu0 }
 0x306   :  { %v630_v14 = vadd.f32 %v629_v13, %v628_v12 }
 0x308   :  { %v463_v18 = vadd.f32 %v630_v14, %v578_v15 }
 0x314   :  { %v663_v16 = vpop.f32.mrb[4].mxu1 }
 0x315   :  { %v664_v17 = vpop.f32.mrb[5].mxu1 }
 0x316   :  { %v665_v19 = vadd.f32 %v664_v17, %v663_v16 }
 0x318   :  { %v533_v20 = vadd.f32 %v665_v19, %v463_v18 }
 0x31a   :  { %v541_v21 = vsel %vm540_vm3, %v533_v20, -1e+30  ;;  %v537_v36 = vsel %vm536_vm5, %v533_v20, 0.0 }
 0x31b   :  { %542 = vmax.xlane.f32.xlu0 %v541_v21 }
 0x3a8   :  { %v543_v22 = vpop.xlane.xlu0 %542 }
 0x3a9   :  { %v544_v23 = vsub.f32 %v541_v21, %v543_v22 }
 0x3ab   :  { %v545_v24 = vmul.f32 1.442695, %v544_v23 }
 0x3ad   :  { %828 = vpow2.f32 %v545_v24 }
 0x3b7   :  { %v829_v25 = vpop.eup %828 }
 0x3b8   :  { %547 = vadd.xlane.f32.xlu1 %v829_v25 }
 0x3c9   :  { %555 = vperm.xlu1 %827, %v27_v26  }
 0x445   :  { %v548_v27 = vpop.xlane.xlu1 %547 }
 0x446   :  { %830 = vlog2.f32 %v548_v27 }
 0x447   :  { %832 = vrcp.f32 %v548_v27 }
 0x449   :  { %v556_v28 = vpop.permute.xlu1 %555 }
 0x44a   :  { %vm557_vm4 = vcmp.eq.s32.totalorder %v989_v53, %v556_v28 }
 0x450   :  { %v831_v29 = vpop.eup %830 }
 0x451   :  { %v833_v30 = vpop.eup %832  ;;  %v550_v31 = vmul.f32 0.6931472, %v831_v29 }
 0x452   :  { %v553_v33 = vmul.f32 %v833_v30, %v829_v25 }
 0x453   :  { %v551_v32 = vsub.f32 %v544_v23, %v550_v31 }
 0x455   :  { %v558_v34 = vsel %vm557_vm4, %v551_v32, 0.0  ;;  %v561_v35 = vmul.f32 %v553_v33, %v551_v32 }
 0x456   :  { %559 = vadd.xlane.f32.xlu1 %v558_v34 }
 0x457   :  { %562 = vadd.xlane.f32.xlu0 %v561_v35 }
 0x45b   :  { %538 = vadd.xlane.f32.xlu0 %v537_v36 }
 0x4e3   :  { %v560_v38 = vpop.xlane.xlu1 %559 }
 0x4e4   :  { %v563_v37 = vpop.xlane.xlu0 %562  ;;  %v565_v39 = vsel %vm536_vm5, %v560_v38, %v553_v33 }
 0x4e5   :  { %v564_v40 = vsub.f32 0.0, %v563_v37 }
 0x4e8   :  { %v539_v41 = vpop.xlane.xlu0 %538 }
 0x4e9   :  { %v567_v42 = vsel %vm566_vm6, %v539_v41, %v565_v39 }
 0x4ea   :  { %v569_v43 = vsel %vm568_vm7, %v564_v40, %v567_v42 }
 0x4eb   :  { %570 = vst [vmem:[%s1260_s7] sm:$0xff] %v569_v43 }

</bundles_post_ra>
